<compile_context>
chip_gen: v6e
topology: v6e:2x2x1
jax: 0.10.0
libtpu: 0.0.40
codegen_flags: <defaults>
</compile_context>

<pallas_src>
import functools

import jax
import jax.numpy as jnp
from jax.experimental import pallas as pl
from jax.experimental.pallas import tpu as pltpu


# --------------------------------------------------------------------------
# small helpers (trace-time Python)
# --------------------------------------------------------------------------
def _round_up(x, m):
    return (x + m - 1) // m * m


def _pick_tile(padded, candidates):
    for c in candidates:
        if padded % c == 0:
            return c
    return 128  # padded dims are always multiples of 128 here


def _m_tiling(M):
    """Adaptive M tile: don't push 15/16 zero rows through the MXU for tiny layers."""
    if M >= 512:
        tm = 256
    elif M >= 128:
        tm = 128
    else:
        tm = max(16, _round_up(M, 16))
    return _round_up(M, tm), tm


def _largest_divisor(n, cap):
    for d in range(min(n, cap), 0, -1):
        if n % d == 0:
            return d
    return 1


# --------------------------------------------------------------------------
# Pallas kernels
# --------------------------------------------------------------------------
def _mm_stats_kernel(a_ref, b_ref, o_ref, st_ref, acc_ref):
    """bf16 matmul with f32 accumulation; emits per-tile column sum / sum-of-squares
    at the last K step (fused BatchNorm statistics)."""
    k = pl.program_id(2)

    @pl.when(k == 0)
    def _():
        acc_ref[...] = jnp.zeros_like(acc_ref)

    acc_ref[...] += jnp.dot(a_ref[...], b_ref[...],
                            preferred_element_type=jnp.float32)

    @pl.when(k == pl.num_programs(2) - 1)
    def _():
        y = acc_ref[...]
        o_ref[...] = y.astype(o_ref.dtype)
        s = jnp.sum(y, axis=0, keepdims=True)
        q = jnp.sum(y * y, axis=0, keepdims=True)
        st_ref[0] = jnp.concatenate([s, q], axis=0)


def _mm_affine_kernel(a_ref, b_ref, s_ref, t_ref, o_ref, acc_ref, *, act):
    """bf16 matmul with a fused act(acc * scale + bias) epilogue at the last K step."""
    k = pl.program_id(2)

    @pl.when(k == 0)
    def _():
        acc_ref[...] = jnp.zeros_like(acc_ref)

    acc_ref[...] += jnp.dot(a_ref[...], b_ref[...],
                            preferred_element_type=jnp.float32)

    @pl.when(k == pl.num_programs(2) - 1)
    def _():
        y = acc_ref[...] * s_ref[...] + t_ref[...]
        if act == "relu":
            y = jnp.maximum(y, 0.0)
        elif act == "sigmoid":
            y = 1.0 / (1.0 + jnp.exp(-y))
        o_ref[...] = y.astype(o_ref.dtype)


def _affine_act_kernel(y_ref, s_ref, b_ref, o_ref, *, act):
    out = y_ref[...].astype(jnp.float32) * s_ref[...] + b_ref[...]
    if act == "relu":
        out = jnp.maximum(out, 0.0)
    elif act == "sigmoid":
        out = 1.0 / (1.0 + jnp.exp(-out))
    o_ref[...] = out.astype(o_ref.dtype)


def _maxpool_kernel(x_ref, o_ref):
    x = x_ref[...]                       # (Rb, 2, Wo, 2, C)
    m = jnp.maximum(x[:, 0], x[:, 1])    # max over the H pair -> (Rb, Wo, 2, C)
    o_ref[...] = jnp.max(m, axis=2)      # max over the W pair -> (Rb, Wo, C)


# --------------------------------------------------------------------------
# Pallas wrappers
# --------------------------------------------------------------------------
def pallas_matmul_stats(a, wm_pad, out_dtype=jnp.bfloat16):
    """a: (M, K) bf16 (unpadded); wm_pad: (Kp, Np) bf16 pre-packed weights.

    Returns (y_pad (Mp, Np) out_dtype, stats (Mp//tm, 2, Np) f32) where stats[:,0]
    are per-tile column sums and stats[:,1] per-tile column sums of squares."""
    M, K = a.shape
    Kp, Np = wm_pad.shape
    Mp, tm = _m_tiling(M)
    tk = _pick_tile(Kp, (512, 256, 128))
    tn = _pick_tile(Np, (512, 256, 128))
    a_p = a
    if (Mp, Kp) != (M, K):
        a_p = jnp.pad(a, ((0, Mp - M), (0, Kp - K)))
    n_i = Mp // tm

    y, stats = pl.pallas_call(
        _mm_stats_kernel,
        out_shape=(jax.ShapeDtypeStruct((Mp, Np), out_dtype),
                   jax.ShapeDtypeStruct((n_i, 2, Np), jnp.float32)),
        grid_spec=pltpu.PrefetchScalarGridSpec(
            num_scalar_prefetch=0,
            grid=(n_i, Np // tn, Kp // tk),
            in_specs=[pl.BlockSpec((tm, tk), lambda i, j, k: (i, k)),
                      pl.BlockSpec((tk, tn), lambda i, j, k: (k, j))],
            out_specs=(pl.BlockSpec((tm, tn), lambda i, j, k: (i, j)),
                       pl.BlockSpec((1, 2, tn), lambda i, j, k: (i, 0, j))),
            scratch_shapes=[pltpu.VMEM((tm, tn), jnp.float32)]),
        compiler_params=pltpu.CompilerParams(
            dimension_semantics=("parallel", "parallel", "arbitrary")),
    )(a_p, wm_pad)
    return y, stats


def pallas_matmul_affine(a, wm_pad, scale_row, bias_row, act,
                         out_dtype=jnp.bfloat16):
    """out = act((a @ wm) * scale + bias), epilogue fused into the matmul."""
    M, K = a.shape
    Kp, Np = wm_pad.shape
    Mp, tm = _m_tiling(M)
    tk = _pick_tile(Kp, (512, 256, 128))
    tn = _pick_tile(Np, (512, 256, 128))
    a_p = a
    if (Mp, Kp) != (M, K):
        a_p = jnp.pad(a, ((0, Mp - M), (0, Kp - K)))

    out = pl.pallas_call(
        functools.partial(_mm_affine_kernel, act=act),
        out_shape=jax.ShapeDtypeStruct((Mp, Np), out_dtype),
        grid_spec=pltpu.PrefetchScalarGridSpec(
            num_scalar_prefetch=0,
            grid=(Mp // tm, Np // tn, Kp // tk),
            in_specs=[pl.BlockSpec((tm, tk), lambda i, j, k: (i, k)),
                      pl.BlockSpec((tk, tn), lambda i, j, k: (k, j)),
                      pl.BlockSpec((1, tn), lambda i, j, k: (0, j)),
                      pl.BlockSpec((1, tn), lambda i, j, k: (0, j))],
            out_specs=pl.BlockSpec((tm, tn), lambda i, j, k: (i, j)),
            scratch_shapes=[pltpu.VMEM((tm, tn), jnp.float32)]),
        compiler_params=pltpu.CompilerParams(
            dimension_semantics=("parallel", "parallel", "arbitrary")),
    )(a_p, wm_pad, scale_row, bias_row)
    return out


def pallas_affine_act(y_pad, scale_row, bias_row, act, out_dtype=jnp.bfloat16):
    """out = act(y * scale + bias) over an already-padded (Mp, Np) tensor."""
    Mp, Np = y_pad.shape
    tm = _largest_divisor(Mp, 512)
    out = pl.pallas_call(
        functools.partial(_affine_act_kernel, act=act),
        out_shape=jax.ShapeDtypeStruct((Mp, Np), out_dtype),
        grid=(Mp // tm,),
        in_specs=[pl.BlockSpec((tm, Np), lambda i: (i, 0)),
                  pl.BlockSpec((1, Np), lambda i: (0, 0)),
                  pl.BlockSpec((1, Np), lambda i: (0, 0))],
        out_specs=pl.BlockSpec((tm, Np), lambda i: (i, 0)),
        compiler_params=pltpu.CompilerParams(
            dimension_semantics=("parallel",)),
    )(y_pad, scale_row, bias_row)
    return out


def pallas_maxpool2x2(x):
    """Single-pass 2x2 / stride-2 max pool, NHWC (bf16 in / bf16 out)."""
    N, H, W, C = x.shape
    Ho, Wo = H // 2, W // 2
    x = x[:, :2 * Ho, :2 * Wo, :]                  # drop odd row/col (PyTorch semantics)
    xr = x.reshape(N * Ho, 2, Wo, 2, C)            # pure row-major reshape, no copy
    R = N * Ho
    Rb = _largest_divisor(R, 8)
    out = pl.pallas_call(
        _maxpool_kernel,
        out_shape=jax.ShapeDtypeStruct((R, Wo, C), x.dtype),
        grid=(R // Rb,),
        in_specs=[pl.BlockSpec((Rb, 2, Wo, 2, C), lambda i: (i, 0, 0, 0, 0))],
        out_specs=pl.BlockSpec((Rb, Wo, C), lambda i: (i, 0, 0)),
        compiler_params=pltpu.CompilerParams(
            dimension_semantics=("parallel",)),
    )(xr)
    return out.reshape(N, Ho, Wo, C)


# --------------------------------------------------------------------------
# Conv / layer helpers (glue in plain JAX, compute in Pallas)
# --------------------------------------------------------------------------
def _im2col(x, kh, kw, padding):
    # TODO(synk): fuse patch extraction into the matmul via shifted-window BlockSpecs
    # so the kh*kw-expanded im2col copy never round-trips through HBM.
    N, H, W, Cin = x.shape
    if padding:
        x = jnp.pad(x, ((0, 0), (padding, padding), (padding, padding), (0, 0)))
    Ho = H + 2 * padding - kh + 1
    Wo = W + 2 * padding - kw + 1
    if kh == 1 and kw == 1:
        patches = x[:, :Ho, :Wo, :]
    else:
        patches = jnp.concatenate(
            [x[:, di:di + Ho, dj:dj + Wo, :]
             for di in range(kh) for dj in range(kw)], axis=-1)
    return patches.reshape(N * Ho * Wo, kh * kw * Cin), (N, Ho, Wo)


def conv_bn_relu(x, p):
    """Conv (no effective bias) -> BatchNorm (training-mode batch stats) -> ReLU."""
    patches, (N, Ho, Wo) = _im2col(x, p["kh"], p["kw"], p["pad"])
    M = N * Ho * Wo
    C = p["Cout"]
    y_pad, stats = pallas_matmul_stats(patches, p["wm"])
    Np = y_pad.shape[1]

    sums = jnp.sum(stats[:, 0, :C], axis=0)
    sqs = jnp.sum(stats[:, 1, :C], axis=0)
    mean = sums / M
    var = jnp.maximum(sqs / M - mean * mean, 0.0)
    rstd = jax.lax.rsqrt(var + p["eps"])
    scale = p["gamma"] * rstd
    bias = p["beta"] - mean * scale
    scale_row = jnp.pad(scale, (0, Np - C)).reshape(1, Np).astype(jnp.float32)
    bias_row = jnp.pad(bias, (0, Np - C)).reshape(1, Np).astype(jnp.float32)

    out_pad = pallas_affine_act(y_pad, scale_row, bias_row, act="relu")
    return out_pad[:M, :C].reshape(N, Ho, Wo, C)


def conv_affine_act(x, p, act, out_dtype=jnp.bfloat16):
    """Conv -> (+bias) -> (*scale) -> activation; epilogue fused into the matmul."""
    patches, (N, Ho, Wo) = _im2col(x, p["kh"], p["kw"], p["pad"])
    M = N * Ho * Wo
    C = p["Cout"]
    out_pad = pallas_matmul_affine(patches, p["wm"], p["scale_row"],
                                   p["bias_row"], act=act, out_dtype=out_dtype)
    return out_pad[:M, :C].reshape(N, Ho, Wo, C)


def upsample_bilinear_2x(x):
    """nn.Upsample(scale_factor=2, mode='bilinear', align_corners=True), NHWC."""
    # TODO(synk): bilinear interpolation (gather + lerp) left in plain JAX glue.
    N, H, W, C = x.shape
    Ho, Wo = 2 * H, 2 * W

    def coords(n_in, n_out):
        if n_in == 1:
            src = jnp.zeros((n_out,), jnp.float32)
        else:
            src = jnp.arange(n_out, dtype=jnp.float32) * (n_in - 1) / (n_out - 1)
        i0 = jnp.clip(jnp.floor(src).astype(jnp.int32), 0, n_in - 1)
        i1 = jnp.clip(i0 + 1, 0, n_in - 1)
        w = src - i0.astype(jnp.float32)
        return i0, i1, w

    y0, y1, wy = coords(H, Ho)
    x0, x1, wx = coords(W, Wo)
    rows = (x[:, y0, :, :] * (1.0 - wy)[None, :, None, None]
            + x[:, y1, :, :] * wy[None, :, None, None])
    out = (rows[:, :, x0, :] * (1.0 - wx)[None, None, :, None]
           + rows[:, :, x1, :] * wx[None, None, :, None])
    return out.astype(jnp.bfloat16)


def inception_layer(x, p):
    x = pallas_maxpool2x2(x)
    x0 = conv_bn_relu(x, p["b0"])
    x1 = conv_bn_relu(conv_bn_relu(x, p["b1_0"]), p["b1_1"])
    x2 = conv_bn_relu(conv_bn_relu(conv_bn_relu(x, p["b2_0"]), p["b2_1"]),
                      p["b2_2"])
    cat = jnp.concatenate([x0, x1, x2], axis=-1)
    # 1x1 conv + bias, * scale, ReLU -- fully fused into the matmul epilogue.
    return conv_affine_act(cat, p["cat_conv"], act="relu")


def up_layer(x_deep, x_skip, p):
    xu = upsample_bilinear_2x(x_deep)
    dY = x_skip.shape[1] - xu.shape[1]
    dX = x_skip.shape[2] - xu.shape[2]
    if dY or dX:
        xu = jnp.pad(xu, ((0, 0),
                          (dY // 2, dY - dY // 2),
                          (dX // 2, dX - dX // 2),
                          (0, 0)))
    x = jnp.concatenate([x_skip, xu], axis=-1)
    return conv_bn_relu(x, p)


def unet_forward(params, x_nchw):
    x = jnp.transpose(x_nchw, (0, 2, 3, 1)).astype(jnp.bfloat16)   # NCHW -> NHWC
    x1 = conv_bn_relu(conv_bn_relu(x, params["inc"]["c1"]), params["inc"]["c2"])
    x2 = inception_layer(x1, params["down1"])
    x3 = inception_layer(x2, params["down2"])
    x4 = inception_layer(x3, params["down3"])
    x5 = inception_layer(x4, params["down4"])
    y = up_layer(x5, x4, params["up1"])
    y = up_layer(y, x3, params["up2"])
    y = up_layer(y, x2, params["up3"])
    y = up_layer(y, x1, params["up4"])
    y = conv_affine_act(y, params["outc"], act="sigmoid", out_dtype=jnp.float32)
    return jnp.transpose(y, (0, 3, 1, 2))                           # NHWC -> NCHW


# --------------------------------------------------------------------------
# Deterministic parameter construction.  Weight packing (transpose to
# (kh*kw*Cin, Cout), pad to MXU-friendly (Kp, Np), cast to bf16) is hoisted
# here so the forward pass never re-prepares weights.
# --------------------------------------------------------------------------
class _KeyGen:
    def __init__(self, key):
        self._key = key

    def __call__(self):
        self._key, sub = jax.random.split(self._key)
        return sub


def _pack_weight(w_oihw):
    Cout, Cin, kh, kw = w_oihw.shape
    K = kh * kw * Cin
    wm = jnp.transpose(w_oihw, (2, 3, 1, 0)).reshape(K, Cout)
    Kp, Np = _round_up(K, 128), _round_up(Cout, 128)
    wm = jnp.pad(wm, ((0, Kp - K), (0, Np - Cout))).astype(jnp.bfloat16)
    return wm, Cout, kh, kw


def _basic_conv_params(kg, cin, cout, k, pad, eps=1e-3):
    # NOTE: the nn.Conv2d bias of init_conv is omitted on purpose: a per-channel
    # conv bias cancels exactly under training-mode BatchNorm (mean shift removes it).
    w = jax.random.normal(kg(), (cout, cin, k, k), jnp.float32) * 0.05
    wm, Cout, kh, kw = _pack_weight(w)
    return {"wm": wm, "Cout": Cout, "kh": kh, "kw": kw, "pad": pad,
            "gamma": 1.0 + 0.1 * jax.random.normal(kg(), (cout,), jnp.float32),
            "beta": 0.1 * jax.random.normal(kg(), (cout,), jnp.float32),
            "eps": eps}


def _pointwise_conv_params(kg, cin, cout, mult=1.0):
    w = jax.random.normal(kg(), (cout, cin, 1, 1), jnp.float32) * 0.05
    b = 0.1 * jax.random.normal(kg(), (cout,), jnp.float32)
    wm, Cout, kh, kw = _pack_weight(w)
    Np = wm.shape[1]
    # out = act((conv + b) * mult)  ==  act(acc * mult + b * mult)
    scale_row = jnp.full((1, Np), mult, jnp.float32)
    bias_row = jnp.pad(b * mult, (0, Np - Cout)).reshape(1, Np).astype(jnp.float32)
    return {"wm": wm, "Cout": Cout, "kh": kh, "kw": kw, "pad": 0,
            "scale_row": scale_row, "bias_row": bias_row}


def _inception_params(kg, cin, cout, scale=1.0):
    h = cin // 2
    return {
        "b0": _basic_conv_params(kg, cin, h, 1, 0),
        "b1_0": _basic_conv_params(kg, cin, h, 1, 0),
        "b1_1": _basic_conv_params(kg, h, h, 3, 1),
        "b2_0": _basic_conv_params(kg, cin, h, 1, 0),
        "b2_1": _basic_conv_params(kg, h, h + cin, 3, 1),
        "b2_2": _basic_conv_params(kg, h + cin, 2 * cin, 3, 1),
        "cat_conv": _pointwise_conv_params(kg, 3 * cin, cout, mult=scale),
    }


def make_unet_params(key, n_channels, n_classes):
    kg = _KeyGen(key)
    return {
        "inc": {"c1": _basic_conv_params(kg, n_channels, 64, 3, 1, eps=1e-5),
                "c2": _basic_conv_params(kg, 64, 64, 3, 1, eps=1e-5)},
        "down1": _inception_params(kg, 64, 128),
        "down2": _inception_params(kg, 128, 256),
        "down3": _inception_params(kg, 256, 512),
        "down4": _inception_params(kg, 512, 512),
        "up1": _basic_conv_params(kg, 1024, 256, 1, 0),
        "up2": _basic_conv_params(kg, 512, 128, 1, 0),
        "up3": _basic_conv_params(kg, 256, 64, 1, 0),
        "up4": _basic_conv_params(kg, 128, 64, 1, 0),
        "outc": _pointwise_conv_params(kg, 64, n_classes),
    }


# --------------------------------------------------------------------------
if __name__ == "__main__":
    n_channels, n_classes = 3, 2
    key = jax.random.PRNGKey(0)
    pkey, xkey = jax.random.split(key)

    params = make_unet_params(pkey, n_channels, n_classes)
    # NCHW input, like PyTorch; spatial 32 so the 4 pool stages stay valid.
    x = jax.random.normal(xkey, (2, n_channels, 32, 32), jnp.float32)

    out = unet_forward(params, x)
    out = jax.block_until_ready(out)

    assert out.shape == (2, n_classes, 32, 32), out.shape
    assert out.dtype == jnp.float32
    assert bool(jnp.all(jnp.isfinite(out)))
    assert bool(jnp.all((out >= 0.0) & (out <= 1.0)))   # sigmoid range
    print("KERNEL_OK")
</pallas_src>

<mosaic_0001>
module attributes {stable_mosaic.version = 11 : i64} {
  func.func @_mm_stats_kernel(%arg0: i32, %arg1: i32, %arg2: i32, %arg3: memref<256x128xbf16, #tpu.memory_space<vmem>>, %arg4: memref<128x128xbf16, #tpu.memory_space<vmem>>, %arg5: memref<256x128xbf16, #tpu.memory_space<vmem>>, %arg6: memref<1x2x128xf32, #tpu.memory_space<vmem>>, %arg7: memref<256x128xf32, #tpu.memory_space<vmem>>) attributes {dimension_semantics = [#tpu.dimension_semantics<parallel>, #tpu.dimension_semantics<parallel>, #tpu.dimension_semantics<arbitrary>], iteration_bounds = array<i64: 8, 1, 1>, scalar_prefetch = 0 : i64, scratch_operands = 1 : i64, tpu.core_type = #tpu.core_type<tc>, window_params = [{transform_indices = @transform_0, window_bounds = array<i64: 256, 128>}, {transform_indices = @transform_1, window_bounds = array<i64: 128, 128>}, {transform_indices = @transform_2, window_bounds = array<i64: 256, 128>}, {transform_indices = @transform_3, window_bounds = array<i64: 1, 2, 128>}]} {
    %c0_i32 = arith.constant 0 : i32
    %0 = arith.cmpi eq, %arg2, %c0_i32 : i32
    %1 = arith.extui %0 : i1 to i32
    %c0_i32_0 = arith.constant 0 : i32
    %2 = arith.cmpi ne, %1, %c0_i32_0 : i32
    scf.if %2 {
      %cst_10 = arith.constant 0.000000e+00 : f32
      %12 = vector.broadcast %cst_10 : f32 to vector<256x128xf32>
      %c0_11 = arith.constant 0 : index
      %c0_12 = arith.constant 0 : index
      %13 = vector.load %arg7[%c0_11, %c0_12] : memref<256x128xf32, #tpu.memory_space<vmem>>, vector<256x128xf32>
      tpu.vector_store %arg7[%c0_11, %c0_12], %12 {strides = array<i32>} : memref<256x128xf32, #tpu.memory_space<vmem>>, vector<256x128xf32>,
    } else {
    }
    %c0 = arith.constant 0 : index
    %c0_1 = arith.constant 0 : index
    %3 = vector.load %arg7[%c0, %c0_1] : memref<256x128xf32, #tpu.memory_space<vmem>>, vector<256x128xf32>
    %c0_2 = arith.constant 0 : index
    %c0_3 = arith.constant 0 : index
    %4 = vector.load %arg3[%c0_2, %c0_3] : memref<256x128xbf16, #tpu.memory_space<vmem>>, vector<256x128xbf16>
    %c0_4 = arith.constant 0 : index
    %c0_5 = arith.constant 0 : index
    %5 = vector.load %arg4[%c0_4, %c0_5] : memref<128x128xbf16, #tpu.memory_space<vmem>>, vector<128x128xbf16>
    %cst = arith.constant dense<0.000000e+00> : vector<256x128xf32>
    %6 = tpu.matmul %4, %5, %cst {dimension_numbers = #tpu.dot_dimension_numbers<[1], [0], [0], [1], [0, 0, 1, 1], [], []>} : vector<256x128xbf16>, vector<128x128xbf16>, vector<256x128xf32> -> vector<256x128xf32>
    %7 = arith.addf %3, %6 : vector<256x128xf32>
    %c0_6 = arith.constant 0 : index
    %c0_7 = arith.constant 0 : index
    %8 = vector.load %arg7[%c0_6, %c0_7] : memref<256x128xf32, #tpu.memory_space<vmem>>, vector<256x128xf32>
    tpu.vector_store %arg7[%c0_6, %c0_7], %7 {strides = array<i32>} : memref<256x128xf32, #tpu.memory_space<vmem>>, vector<256x128xf32>,
    %c0_i32_8 = arith.constant 0 : i32
    %9 = arith.cmpi eq, %arg2, %c0_i32_8 : i32
    %10 = arith.extui %9 : i1 to i32
    %c0_i32_9 = arith.constant 0 : i32
    %11 = arith.cmpi ne, %10, %c0_i32_9 : i32
    scf.if %11 {
      %c0_10 = arith.constant 0 : index
      %c0_11 = arith.constant 0 : index
      %12 = vector.load %arg7[%c0_10, %c0_11] : memref<256x128xf32, #tpu.memory_space<vmem>>, vector<256x128xf32>
      %13 = arith.truncf %12 : vector<256x128xf32> to vector<256x128xbf16>
      %c0_12 = arith.constant 0 : index
      %c0_13 = arith.constant 0 : index
      %14 = vector.load %arg5[%c0_12, %c0_13] : memref<256x128xbf16, #tpu.memory_space<vmem>>, vector<256x128xbf16>
      tpu.vector_store %arg5[%c0_12, %c0_13], %13 {strides = array<i32>} : memref<256x128xbf16, #tpu.memory_space<vmem>>, vector<256x128xbf16>,
      %cst_14 = arith.constant dense<0.000000e+00> : vector<128xf32>
      %15 = vector.multi_reduction <add>, %12, %cst_14 [0] : vector<256x128xf32> to vector<128xf32>
      %16 = vector.shape_cast %15 : vector<128xf32> to vector<1x128xf32>
      %17 = arith.mulf %12, %12 : vector<256x128xf32>
      %cst_15 = arith.constant dense<0.000000e+00> : vector<128xf32>
      %18 = vector.multi_reduction <add>, %17, %cst_15 [0] : vector<256x128xf32> to vector<128xf32>
      %19 = vector.shape_cast %18 : vector<128xf32> to vector<1x128xf32>
      %20 = tpu.concatenate %16, %19 in 0 : vector<1x128xf32>, vector<1x128xf32> -> vector<2x128xf32>
      %c0_16 = arith.constant 0 : index
      %c0_17 = arith.constant 0 : index
      %c0_18 = arith.constant 0 : index
      %21 = vector.load %arg6[%c0_16, %c0_17, %c0_18] : memref<1x2x128xf32, #tpu.memory_space<vmem>>, vector<1x2x128xf32>
      %22 = vector.shape_cast %21 : vector<1x2x128xf32> to vector<2x128xf32>
      %23 = vector.shape_cast %20 : vector<2x128xf32> to vector<1x2x128xf32>
      tpu.vector_store %arg6[%c0_16, %c0_17, %c0_18], %23 {strides = array<i32>} : memref<1x2x128xf32, #tpu.memory_space<vmem>>, vector<1x2x128xf32>,
    } else {
    }
    return
  }
  func.func @transform_0(%arg0: i32, %arg1: i32, %arg2: i32) -> (i32, i32) {
    %c0_i32 = arith.constant 0 : i32
    return %arg0, %arg2 : i32, i32
  }
  func.func @transform_1(%arg0: i32, %arg1: i32, %arg2: i32) -> (i32, i32) {
    %c0_i32 = arith.constant 0 : i32
    return %arg2, %arg1 : i32, i32
  }
  func.func @transform_2(%arg0: i32, %arg1: i32, %arg2: i32) -> (i32, i32) {
    %c0_i32 = arith.constant 0 : i32
    return %arg0, %arg1 : i32, i32
  }
  func.func @transform_3(%arg0: i32, %arg1: i32, %arg2: i32) -> (i32, i32, i32) {
    %c0_i32 = arith.constant 0 : i32
    %c0_i32_0 = arith.constant 0 : i32
    return %arg0, %c0_i32, %arg1 : i32, i32, i32
  }
}

</mosaic_0001>

<bundles_post_ra>
// kernel: tpu_custom_call.1
= control target key start
LH: loop header
LB: loop body
LE: loop exit
PB: predicated region body
PF: predicated region fallthrough
CT: control target
= control target key end

     0   :  { %9 = vsyncpa [#allocation4], 0  ;;  %s2157_s0 = inlined_call_operand.hbm [shape: bf16[2048,128], index: 0, kind: input, shape index: {}]   ;;  %s2158_s1 = inlined_call_operand.hbm [shape: bf16[128,128], index: 1, kind: input, shape index: {}]   ;;  %s2159_s2 = inlined_call_operand.hbm [shape: bf16[2048,128], index: 2, kind: output, shape index: {0}]   ;;  %s2160_s3 = inlined_call_operand.hbm [shape: f32[8,2,128], index: 3, kind: output, shape index: {1}]  }
   0x1   :  { %11 = vsyncpa [#allocation4 + $0x1], 0 }
   0x2   :  { %12 = vsyncpa [#allocation7], 0 }
   0x3   :  { %13 = vsyncpa [#allocation5], 0 }
   0x4   :  { %15 = vsyncpa [#allocation5 + $0x1], 0 }
   0x5   :  { %16 = vsyncpa [#allocation10], 0 }
   0x6   :  { %18 = vsyncpa [#allocation10 + $0x1], 0  ;;  %s1811_s12 = smov 0   ;;  %s1813_s13 = smov 0  }
   0x7   :  { %s1815_s14 = smov 0   ;;  %s1817_s15 = smov 0  }
   0x8   :  { %s1819_s16 = smov 0   ;;  %s1821_s17 = smov 0  }
   0x9 LB: > { %s1214_s18 = sadd.s32 4294967295, %s1781_s17   ;;  %s1215_s19 = sadd.s32 4294967294, %s1781_s17   ;;  %s1781_s17 = sphi %s1821_s17, %s24_s17   ;;  %s1777_s16 = sphi %s1819_s16, %s2181_s16   ;;  %s1773_s15 = sphi %s1817_s15, %s2180_s15   ;;  %s1769_s14 = sphi %s1815_s14, %s2179_s14   ;;  %s1765_s13 = sphi %s1813_s13, %s2178_s13   ;;  %s1761_s12 = sphi %s1811_s12, %s2177_s12  }
   0xa   : > { %p65_p0 = scmp.ne.s32.totalorder %s1765_s13, %s1761_s12  ;;  %p1845_p1 = scmp.eq.s32.totalorder %s1214_s18, 0 }
   0xb   : > { %p1849_p2 = scmp.eq.s32.totalorder %s1214_s18, 7  ;;  %p125_p3 = scmp.eq.s32.totalorder %s1215_s19, 7 }
   0xc   : > { %p1855_p4 = por %p1845_p1, %p65_p0  ;;  %p1216_p5 = scmp.ge.s32.totalorder %s1781_s17, 1 }
   0xd   : > { %p1860_p6 = por %p125_p3, %p65_p0  ;;  %p160_p7 = scmp.lt.s32.totalorder %s1781_s17, 9 }
   0xe   : > { %s1783_s25 = smov [#allocation6]   ;;  %s43_s28 = sadd.s32 1, %s1777_s16 }
   0xf   : > { %s2167_s23 = scalar_select %p1860_p6, 1, 0 }
  0x10   : > { %p1865_p8 = pnand %p1216_p5, %p160_p7  ;;  %s176_s26 = sshll.u32 %s1783_s25, 4  ;;  %s177_s26 = int_to_ptr.vmem [resolvable:$true] %s176_s26 }
  0x11   : > { %s1624_s29 = scalar_lea.vmem %s177_s26, 1024  ;;  %p1632_p3 = scmp.lt.s32.totalorder %s177_s26, %s177_s26 }
  0x12   : > { %p1517_p9 = pneg %p1865_p8  ;;  %p1625_p12 = scmp.ne.s32.totalorder %s177_s26, %s1624_s29 }
  0x13   : > { %p1633_p5 = scmp.lt.s32.totalorder %s1624_s29, %s1624_s29 }
  0x14   : > { %p1873_p10 = pnand %p1517_p9, %p1845_p1 }
  0x15   : > { %p1634_p7 = por %p1633_p5, %p1632_p3 }
  0x16   : > { %p1615_p11 = pneg %p1873_p10 }
  0x18   : > { %p1627_p13 = pnand %p1625_p12, %p1615_p11 }
  0x1a   : > { %p1628_p0 = pneg %p1627_p13 }
  0x1c   : > { %p1635_p6 = pnand %p1634_p7, %p1628_p0 }
  0x1e   : > { %1638 = shalt.err (!%p1635_p6)
}
  0x1f   : > { %s2161_s30 = smov 64   ;;  %s2162_s4 = smov 4  }
  0x20   : > { %1520 = dma.hbm_to_vmem [thread:$0]  (!%p1873_p10), %s2158_s1, 1024, %s177_s26, [#allocation7], %s2161_s30, %s2161_s30, %s2162_s4  }
  0x21   : > { %p45_p6 = scmp.ge.s32.totalorder %s43_s28, 8  ;;  %s52_s7 = sadd.s32 1, %s1769_s14 }
  0x22   : > { %p59_p9 = scmp.ne.s32.totalorder %s1769_s14, %s1765_s13  ;;  %p60_p11 = scmp.eq.s32.totalorder %s1781_s17, 0 }
  0x23   : > { %s2183_s28 = smov (%p45_p6, %s43_s28), 0  ;;  %p1533_p0 = scmp.lt.s32.totalorder %s1781_s17, 8 }
  0x24   : > { %p1894_p12 = por %p60_p11, %p59_p9  ;;  %p1900_p13 = por %p1849_p2, %p59_p9 }
  0x25   : > { %s47_s10 = ssub.s32 %s1777_s16, %s2183_s28  ;;  %s190_s11 = sand.u32 1, %s1769_s14  }
  0x26   : > { %s2171_s9 = scalar_select %p1900_p13, 1, 0 }
  0x27   : > { %p50_p10 = scmp.eq.s32.totalorder %s47_s10, 0  ;;  %s1219_s18 = sshll.u32 %s190_s11, 7 }
  0x28   : > { %s1290_s25 = sshll.u32 %s1777_s16, 11  ;;  %s194_s5 = scalar_lea.vmem [#allocation3], %s1219_s18 }
  0x29   : > { %s1909_s19 = scalar_select %p50_p10, %s1769_s14, %s52_s7  }
  0x2a   : > { %s201_s29 = scalar_lea.hbm %s2157_s0, %s1290_s25  ;;  %s202_s6 = sshll.u32 %s194_s5, 4  ;;  %s203_s6 = int_to_ptr.vmem [resolvable:$true] %s202_s6 }
  0x2b   : > { %p1917_p2 = pnand %p1533_p0, %p1894_p12  ;;  %s191_s30 = scalar_lea.sflag [#allocation4], %s190_s11 }
  0x2c   : > { %s1652_s10 = scalar_lea.vmem %s203_s6, 2048  ;;  %s1786_s7 = smov [#allocation3]  }
  0x2d   : > { %p1641_p3 = pneg %p1917_p2  ;;  %p1653_p5 = scmp.ne.s32.totalorder %s203_s6, %s1652_s10 }
  0x2e   : > { %s1657_s4 = sshll.u32 %s1786_s7, 4  ;;  %s1658_s4 = int_to_ptr.vmem [resolvable:$false] %s1657_s4 }
  0x2f   : > { %p1655_p7 = pnand %p1653_p5, %p1641_p3  ;;  %s1659_s25 = scalar_lea.vmem %s1658_s4, 4096 }
  0x30   : > { %p1660_p9 = scmp.lt.s32.totalorder %s203_s6, %s1658_s4  ;;  %p1661_p11 = scmp.lt.s32.totalorder %s1659_s25, %s1652_s10 }
  0x31   : > { %p1656_p6 = pneg %p1655_p7 }
  0x32   : > { %p1662_p10 = por %p1661_p11, %p1660_p9 }
  0x34   : > { %p1663_p13 = pnand %p1662_p10, %p1656_p6 }
  0x36   : > { %1666 = shalt.err (!%p1663_p13)
}
  0x37   : > { %s2173_s8 = smov 4   ;;  %s2174_s18 = smov 64  }
  0x38   : > { %1524 = dma.hbm_to_vmem [thread:$0]  (!%p1917_p2), %s201_s29, 2048, %s203_s6, %s191_s30, %s2174_s18, %s2174_s18, %s2173_s8  }
  0x39   : > { %214 = sbr.rel (%p1865_p8) target bundleno = 397 (0x18d), region = 28  ;;  %s1931_s11 = sand.u32 (!%p1865_p8), 1, %s1765_s13  }
  0x3a   : > { %s1223_s4 = sshll.u32 (!%p1865_p8), %s1931_s11, 7  ;;  %s217_s26 = scalar_lea.sflag (!%p1865_p8), [#allocation4], %s1931_s11 }
  0x3b   : > { %s1937_s27 = scalar_lea.vmem (!%p1865_p8), [#allocation3], %s1223_s4 }
  0x3e   : > { %1744 = dma.done.wait (%p1855_p4), %s217_s26, 2048  }
  0x3f   : > { %1746 = vsyncadd (%p1855_p4), %s217_s26, 4294965248 }
  0x40   : > { %1748 = dma.done.wait (%p1845_p1), [#allocation7], 1024  }
  0x41   : > { %1750 = vsyncadd (%p1845_p1), [#allocation7], 4294966272  ;;  %v1589_v0 = vld [vmem:[#allocation6 + $0x38] sm:$0xff]   ;;  %v1590_v1 = vld [vmem:[#allocation6 + $0x30] sm:$0xff]   ;;  %s1975_s20 = scalar_lea.vmem [#allocation8], %s1223_s4  ;;  %s1323_s22 = sshll.u32 %s1773_s15, 11 }
  0x42   : > { %1443 = vmatprep.subr.bf16.mxu0 %v1589_v0  ;;  %1491 = vmatprep.subr.bf16.mxu1 %v1589_v0  ;;  %v1591_v2 = vld [vmem:[#allocation6 + $0x28] sm:$0xff]   ;;  %v1592_v3 = vld [vmem:[#allocation6 + $0x20] sm:$0xff]   ;;  %v1593_v5 = vld [vmem:[#allocation6 + $0x18] sm:$0xff]   ;;  %s1065_s24 = sshll.u32 %s1975_s20, 4  ;;  %s2031_s5 = scalar_lea.hbm %s2159_s2, %s1323_s22  ;;  %s2033_s24 = int_to_ptr.vmem [resolvable:$true] %s1065_s24 }
  0x43   : > { %1444 = vmatpush3.bf16.msra.mxu0 %v1589_v0  ;;  %1499 = vmatpush3.bf16.msra.mxu1 %v1589_v0  ;;  %v1597_v4 = vld [vmem:[%s1937_s27] sm:$0xff]   ;;  %v1594_v6 = vld [vmem:[#allocation6 + $0x10] sm:$0xff]   ;;  %v1595_v8 = vld [vmem:[#allocation6 + $0x8] sm:$0xff]   ;;  %s1046_s6 = scalar_lea.sflag [#allocation5], %s1931_s11  ;;  %s1667_s21 = scalar_lea.vmem %s2033_s24, 2048 }
  0x44   : > { %1445 = vmatprep.subr.bf16.mxu0 %v1590_v1  ;;  %1492 = vmatprep.subr.bf16.mxu1 %v1590_v1  ;;  %v1605_v7 = vld [vmem:[%s1937_s27 + $0x40] sm:$0xff]   ;;  %v1598_v10 = vld [vmem:[%s1937_s27 + $0x8] sm:$0xff]   ;;  %v1599_v12 = vld [vmem:[%s1937_s27 + $0x10] sm:$0xff]   ;;  %p1668_p1 = scmp.ne.s32.totalorder %s2033_s24, %s1667_s21  ;;  %p2175_p4 = scmp.ne.s32.totalorder %s2171_s9, 0 }
  0x45   : > { %1459 = vmatprep.mubr.bf16.mxu0 %v1597_v4  ;;  %1475 = vmatprep.mubr.bf16.mxu1 %v1605_v7  ;;  %v1596_v9 = vld [vmem:[#allocation6] sm:$0xff]   ;;  %v1606_v11 = vld [vmem:[%s1937_s27 + $0x48] sm:$0xff]   ;;  %v1607_v13 = vld [vmem:[%s1937_s27 + $0x50] sm:$0xff]   ;;  %s1787_s10 = smov [#allocation8]  }
  0x46   : > { %v1600_v14 = vld [vmem:[%s1937_s27 + $0x18] sm:$0xff]   ;;  %v1601_v16 = vld [vmem:[%s1937_s27 + $0x20] sm:$0xff]   ;;  %v1602_v18 = vld [vmem:[%s1937_s27 + $0x28] sm:$0xff]   ;;  %p1669_p8 = pnand %p1668_p1, %p2175_p4  ;;  %s1671_s7 = sshll.u32 %s1787_s10, 4  ;;  %s1672_s7 = int_to_ptr.vmem [resolvable:$false] %s1671_s7 }
  0x47   : > { %1446 = vmatpush3.bf16.msra.mxu0 %v1590_v1  ;;  %1500 = vmatpush3.bf16.msra.mxu1 %v1590_v1  ;;  %v1608_v15 = vld [vmem:[%s1937_s27 + $0x58] sm:$0xff]   ;;  %v1609_v17 = vld [vmem:[%s1937_s27 + $0x60] sm:$0xff]   ;;  %v1610_v19 = vld [vmem:[%s1937_s27 + $0x68] sm:$0xff]   ;;  %s1673_s25 = scalar_lea.vmem %s1672_s7, 4096  ;;  %p1674_p13 = scmp.lt.s32.totalorder %s2033_s24, %s1672_s7 }
  0x48   : > { %1447 = vmatprep.subr.bf16.mxu0 %v1591_v2  ;;  %1493 = vmatprep.subr.bf16.mxu1 %v1591_v2  ;;  %v1603_v20 = vld [vmem:[%s1937_s27 + $0x30] sm:$0xff]   ;;  %v1604_v22 = vld [vmem:[%s1937_s27 + $0x38] sm:$0xff]   ;;  %p1670_p12 = pneg %p1669_p8  ;;  %p1675_p0 = scmp.lt.s32.totalorder %s1673_s25, %s1667_s21 }
  0x49   : > { %v1611_v21 = vld [vmem:[%s1937_s27 + $0x70] sm:$0xff]   ;;  %v1612_v23 = vld [vmem:[%s1937_s27 + $0x78] sm:$0xff]  }
  0x4a   : > { %p1676_p2 = por %p1675_p0, %p1674_p13 }
  0x4b   : > { %1448 = vmatpush3.bf16.msra.mxu0 %v1591_v2  ;;  %1501 = vmatpush3.bf16.msra.mxu1 %v1591_v2 }
  0x4c   : > { %1449 = vmatprep.subr.bf16.mxu0 %v1592_v3  ;;  %1494 = vmatprep.subr.bf16.mxu1 %v1592_v3  ;;  %p1677_p3 = pnand %p1676_p2, %p1670_p12 }
  0x4f   : > { %1450 = vmatpush3.bf16.msra.mxu0 %v1592_v3  ;;  %1502 = vmatpush3.bf16.msra.mxu1 %v1592_v3 }
  0x50   : > { %1451 = vmatprep.subr.bf16.mxu0 %v1593_v5  ;;  %1495 = vmatprep.subr.bf16.mxu1 %v1593_v5 }
  0x53   : > { %1452 = vmatpush3.bf16.msra.mxu0 %v1593_v5  ;;  %1503 = vmatpush3.bf16.msra.mxu1 %v1593_v5 }
  0x54   : > { %1453 = vmatprep.subr.bf16.mxu0 %v1594_v6  ;;  %1496 = vmatprep.subr.bf16.mxu1 %v1594_v6 }
  0x57   : > { %1454 = vmatpush3.bf16.msra.mxu0 %v1594_v6  ;;  %1504 = vmatpush3.bf16.msra.mxu1 %v1594_v6 }
  0x58   : > { %1455 = vmatprep.subr.bf16.mxu0 %v1595_v8  ;;  %1497 = vmatprep.subr.bf16.mxu1 %v1595_v8 }
  0x5b   : > { %1456 = vmatpush3.bf16.msra.mxu0 %v1595_v8  ;;  %1505 = vmatpush3.bf16.msra.mxu1 %v1595_v8 }
  0x5c   : > { %1457 = vmatprep.subr.bf16.mxu0 %v1596_v9  ;;  %1498 = vmatprep.subr.bf16.mxu1 %v1596_v9 }
  0x5f   : > { %1458 = vmatpush3.bf16.msra.mxu0 %v1596_v9  ;;  %1506 = vmatpush3.bf16.msra.mxu1 %v1596_v9 }
  0x62   : > { %1460 = vmatmul.mubr.bf16.vlgmr.msra.gmra.mxu0 %v1598_v10  ;;  %1476 = vmatmul.mubr.bf16.vlgmr.msra.gmra.mxu1 %v1606_v11 }
  0x63   : > { %1463 = vmatprep.mubr.bf16.mxu0 %v1599_v12  ;;  %1479 = vmatprep.mubr.bf16.mxu1 %v1607_v13 }
  0x6a   : > { %1464 = vmatmul.mubr.bf16.gmra.mxu0 %v1600_v14  ;;  %1480 = vmatmul.mubr.bf16.gmra.mxu1 %v1608_v15 }
  0x6b   : > { %1467 = vmatprep.mubr.bf16.mxu0 %v1601_v16  ;;  %1483 = vmatprep.mubr.bf16.mxu1 %v1609_v17 }
  0x72   : > { %1468 = vmatmul.mubr.bf16.gmra.mxu0 %v1602_v18  ;;  %1484 = vmatmul.mubr.bf16.gmra.mxu1 %v1610_v19 }
  0x73   : > { %1471 = vmatprep.mubr.bf16.mxu0 %v1603_v20  ;;  %1487 = vmatprep.mubr.bf16.mxu1 %v1611_v21 }
  0x7a   : > { %1472 = vmatmul.mubr.bf16.gmra.mxu0 %v1604_v22  ;;  %1488 = vmatmul.mubr.bf16.gmra.mxu1 %v1612_v23 }
 0x122   : > { %v1461_v24 = vpop.f32.mrf.mxu0  ;;  %v1963_v25 = vpop.f32.mrf.mxu1 }
 0x123   : > { %v975_v41 = vmul.f32 %v1461_v24, %v1461_v24 }
 0x124   : > { %v550_v26 = vpop.f32.mrf.mxu0  ;;  %v1965_v27 = vpop.f32.mrf.mxu1 }
 0x125   : > { %v973_v32 = vmul.f32 %v550_v26, %v550_v26 }
 0x126   : > { %v1462_v28 = vpop.f32.mrf.mxu0  ;;  %v1967_v29 = vpop.f32.mrf.mxu1 }
 0x127   : > { %v1332_v30 = vpack.c.bf16 %v1462_v28, %v1461_v24  ;;  %v1372_v31 = vpack.c.bf16 %v1967_v29, %v1963_v25  ;;  %v976_v46 = vmul.f32 %v1462_v28, %v1462_v28 }
 0x128   : > { %v553_v33 = vpop.f32.mrf.mxu0  ;;  %v1971_v34 = vpop.f32.mrf.mxu1 }
 0x129   : > { %1404 = vst [vmem:[%s1975_s20 + $0x8] sm:$0xff] %v1332_v30   ;;  %v1327_v35 = vpack.c.bf16 %v553_v33, %v550_v26  ;;  %v936_v36 = vadd.f32 %v553_v33, %v550_v26  ;;  %v974_v37 = vmul.f32 %v553_v33, %v553_v33  ;;  %1412 = vst [vmem:[%s1975_s20 + $0x48] sm:$0xff] %v1372_v31  }
 0x12a   : > { %v1367_v38 = vpack.c.bf16 %v1971_v34, %v1965_v27  ;;  %v1465_v39 = vpop.f32.mrf.mxu0  ;;  %v1981_v40 = vpop.f32.mrf.mxu1 }
 0x12b   : > { %1328 = vst [vmem:[%s1975_s20] sm:$0xff] %v1327_v35   ;;  %v937_v42 = vadd.f32 %v1461_v24, %v936_v36  ;;  %v1005_v43 = vadd.f32 %v974_v37, %v973_v32  ;;  %v979_v1 = vmul.f32 %v1465_v39, %v1465_v39 }
 0x12c   : > { %1411 = vst [vmem:[%s1975_s20 + $0x40] sm:$0xff] %v1367_v38   ;;  %v566_v44 = vpop.f32.mrf.mxu0  ;;  %v1985_v45 = vpop.f32.mrf.mxu1 }
 0x12d   : > { %v1006_v47 = vadd.f32 %v1005_v43, %v975_v41  ;;  %v938_v48 = vadd.f32 %v1462_v28, %v937_v42  ;;  %v977_v52 = vmul.f32 %v566_v44, %v566_v44 }
 0x12e   : > { %v1466_v49 = vpop.f32.mrf.mxu0  ;;  %v1987_v50 = vpop.f32.mrf.mxu1 }
 0x12f   : > { %v939_v51 = vadd.f32 %v938_v48, %v566_v44  ;;  %v1007_v53 = vadd.f32 %v1006_v47, %v976_v46  ;;  %v1342_v54 = vpack.c.bf16 %v1466_v49, %v1465_v39  ;;  %v1382_v56 = vpack.c.bf16 %v1987_v50, %v1981_v40 }
 0x130   : > { %v569_v55 = vpop.f32.mrf.mxu0  ;;  %v1991_v57 = vpop.f32.mrf.mxu1  ;;  %v980_v6 = vmul.f32 %v1466_v49, %v1466_v49 }
 0x131   : > { %v1008_v58 = vadd.f32 %v1007_v53, %v977_v52  ;;  %1406 = vst [vmem:[%s1975_s20 + $0x18] sm:$0xff] %v1342_v54   ;;  %v1337_v59 = vpack.c.bf16 %v569_v55, %v566_v44  ;;  %v940_v60 = vadd.f32 %v939_v51, %v569_v55  ;;  %v978_v61 = vmul.f32 %v569_v55, %v569_v55 }
 0x132   : > { %v1469_v62 = vpop.f32.mrf.mxu0  ;;  %1414 = vst [vmem:[%s1975_s20 + $0x58] sm:$0xff] %v1382_v56   ;;  %v1377_v63 = vpack.c.bf16 %v1991_v57, %v1985_v45  ;;  %v1997_v0 = vpop.f32.mrf.mxu1 }
 0x133   : > { %1405 = vst [vmem:[%s1975_s20 + $0x10] sm:$0xff] %v1337_v59   ;;  %v941_v2 = vadd.f32 %v1465_v39, %v940_v60  ;;  %v1009_v3 = vadd.f32 %v1008_v58, %v978_v61  ;;  %v983_v26 = vmul.f32 %v1469_v62, %v1469_v62 }
 0x134   : > { %v582_v4 = vpop.f32.mrf.mxu0  ;;  %1413 = vst [vmem:[%s1975_s20 + $0x50] sm:$0xff] %v1377_v63   ;;  %v2001_v5 = vpop.f32.mrf.mxu1 }
 0x135   : > { %v1010_v7 = vadd.f32 %v1009_v3, %v979_v1  ;;  %v942_v8 = vadd.f32 %v1466_v49, %v941_v2  ;;  %v981_v12 = vmul.f32 %v582_v4, %v582_v4 }
 0x136   : > { %v1470_v9 = vpop.f32.mrf.mxu0  ;;  %v2003_v10 = vpop.f32.mrf.mxu1 }
 0x137   : > { %v943_v11 = vadd.f32 %v942_v8, %v582_v4  ;;  %v1011_v13 = vadd.f32 %v1010_v7, %v980_v6  ;;  %v1352_v14 = vpack.c.bf16 %v1470_v9, %v1469_v62  ;;  %v1392_v16 = vpack.c.bf16 %v2003_v10, %v1997_v0 }
 0x138   : > { %v585_v15 = vpop.f32.mrf.mxu0  ;;  %v2007_v17 = vpop.f32.mrf.mxu1  ;;  %v984_v33 = vmul.f32 %v1470_v9, %v1470_v9 }
 0x139   : > { %v1012_v18 = vadd.f32 %v1011_v13, %v981_v12  ;;  %1408 = vst [vmem:[%s1975_s20 + $0x28] sm:$0xff] %v1352_v14   ;;  %v1347_v19 = vpack.c.bf16 %v585_v15, %v582_v4  ;;  %v944_v20 = vadd.f32 %v943_v11, %v585_v15  ;;  %v982_v21 = vmul.f32 %v585_v15, %v585_v15 }
 0x13a   : > { %v1473_v22 = vpop.f32.mrf.mxu0  ;;  %1416 = vst [vmem:[%s1975_s20 + $0x68] sm:$0xff] %v1392_v16   ;;  %v1387_v23 = vpack.c.bf16 %v2007_v17, %v2001_v5  ;;  %v2013_v24 = vpop.f32.mrf.mxu1 }
 0x13b   : > { %1407 = vst [vmem:[%s1975_s20 + $0x20] sm:$0xff] %v1347_v19   ;;  %v945_v28 = vadd.f32 %v1469_v62, %v944_v20  ;;  %v1013_v30 = vadd.f32 %v1012_v18, %v982_v21  ;;  %v987_v54 = vmul.f32 %v1473_v22, %v1473_v22 }
 0x13c   : > { %v598_v31 = vpop.f32.mrf.mxu0  ;;  %1415 = vst [vmem:[%s1975_s20 + $0x60] sm:$0xff] %v1387_v23   ;;  %v2017_v32 = vpop.f32.mrf.mxu1 }
 0x13d   : > { %v1014_v35 = vadd.f32 %v1013_v30, %v983_v26  ;;  %v946_v36 = vadd.f32 %v1470_v9, %v945_v28  ;;  %v985_v41 = vmul.f32 %v598_v31, %v598_v31 }
 0x13e   : > { %v1474_v37 = vpop.f32.mrf.mxu0  ;;  %v2019_v38 = vpop.f32.mrf.mxu1 }
 0x13f   : > { %v947_v39 = vadd.f32 %v946_v36, %v598_v31  ;;  %v1015_v42 = vadd.f32 %v1014_v35, %v984_v33  ;;  %v1362_v43 = vpack.c.bf16 %v1474_v37, %v1473_v22  ;;  %v1402_v46 = vpack.c.bf16 %v2019_v38, %v2013_v24 }
 0x140   : > { %v601_v44 = vpop.f32.mrf.mxu0  ;;  %v2025_v47 = vpop.f32.mrf.mxu1  ;;  %v988_v58 = vmul.f32 %v1474_v37, %v1474_v37 }
 0x141   : > { %v1016_v48 = vadd.f32 %v1015_v42, %v985_v41  ;;  %1410 = vst [vmem:[%s1975_s20 + $0x38] sm:$0xff] %v1362_v43   ;;  %v1357_v49 = vpack.c.bf16 %v601_v44, %v598_v31  ;;  %v948_v51 = vadd.f32 %v947_v39, %v601_v44  ;;  %v986_v52 = vmul.f32 %v601_v44, %v601_v44 }
 0x142   : > { %1418 = vst [vmem:[%s1975_s20 + $0x78] sm:$0xff] %v1402_v46   ;;  %v1397_v53 = vpack.c.bf16 %v2025_v47, %v2017_v32 }
 0x143   : > { %1409 = vst [vmem:[%s1975_s20 + $0x30] sm:$0xff] %v1357_v49   ;;  %v949_v55 = vadd.f32 %v1473_v22, %v948_v51  ;;  %v1017_v56 = vadd.f32 %v1016_v48, %v986_v52 }
 0x144   : > { %1417 = vst [vmem:[%s1975_s20 + $0x70] sm:$0xff] %v1397_v53  }
 0x145   : > { %v950_v59 = vadd.f32 %v1474_v37, %v949_v55  ;;  %v1018_v60 = vadd.f32 %v1017_v56, %v987_v54 }
 0x146   : > { %1680 = shalt.err (!%p1677_p3)
}
 0x147   : > { %s1681_s8 = scalar_lea.hbm %s2031_s5, 2048  ;;  %s1685_s26 = scalar_lea.hbm %s2159_s2, 16384 }
 0x148   : > { %p1682_p5 = scmp.ne.s32.totalorder %s2031_s5, %s1681_s8  ;;  %p1686_p9 = scmp.lt.s32.totalorder %s2031_s5, %s2159_s2 }
 0x149   : > { %p1687_p11 = scmp.lt.s32.totalorder %s1685_s26, %s1681_s8 }
 0x14a   : > { %p1683_p7 = pnand %p1682_p5, %p2175_p4 }
 0x14b   : > { %p1688_p10 = por %p1687_p11, %p1686_p9 }
 0x14c   : > { %p1684_p6 = pneg %p1683_p7 }
 0x14e   : > { %p1689_p1 = pnand %p1688_p10, %p1684_p6 }
 0x150   : > { %1692 = shalt.err (!%p1689_p1)
}
 0x151   : > { %s1788_s22 = smov 64   ;;  %s1789_s30 = smov 4   ;;  %v989_v61 = vmul.f32 %v1965_v27, %v1965_v27  ;;  %v1019_v62 = vadd.f32 %v1018_v60, %v988_v58  ;;  %v951_v63 = vadd.f32 %v950_v59, %v1965_v27  ;;  %v990_v2 = vmul.f32 %v1971_v34, %v1971_v34 }
 0x152   : > { %1513 = dma.vmem_to_hbm [thread:$0]  (%p2175_p4), %s2033_s24, 2048, %s2031_s5, %s1046_s6, %s1788_s22, %s1788_s22, %s1789_s30   ;;  %v991_v4 = vmul.f32 %v1963_v25, %v1963_v25  ;;  %v992_v8 = vmul.f32 %v1967_v29, %v1967_v29  ;;  %v993_v12 = vmul.f32 %v1985_v45, %v1985_v45  ;;  %v994_v15 = vmul.f32 %v1991_v57, %v1991_v57 }
 0x153   : > { %v952_v1 = vadd.f32 %v951_v63, %v1971_v34  ;;  %v1020_v3 = vadd.f32 %v1019_v62, %v989_v61  ;;  %v997_v21 = vmul.f32 %v2001_v5, %v2001_v5  ;;  %v998_v26 = vmul.f32 %v2007_v17, %v2007_v17  ;;  %s1226_s24 = sshll.u32 %s1931_s11, 1  ;;  %s1287_s29 = sshll.u32 %s1773_s15, 5 }
 0x154   : > { %v1001_v35 = vmul.f32 %v2017_v32, %v2017_v32  ;;  %v1003_v39 = vmul.f32 %v2013_v24, %v2013_v24  ;;  %s251_s5 = scalar_lea.vmem [#allocation9], %s1226_s24  ;;  %vm1042_vm0 = vcmask 1040384   ;;  %s2116_s7 = scalar_lea.hbm %s2160_s3, %s1287_s29 }
 0x155   : > { %v953_v6 = vadd.f32 %v1963_v25, %v952_v1  ;;  %v1021_v7 = vadd.f32 %v1020_v3, %v990_v2  ;;  %v995_v25 = vmul.f32 %v1981_v40, %v1981_v40  ;;  %s1082_s6 = sshll.u32 %s251_s5, 4  ;;  %s1051_s25 = scalar_lea.sflag [#allocation10], %s1931_s11  ;;  %s1083_s6 = int_to_ptr.vmem [resolvable:$true] %s1082_s6 }
 0x156   : > { %s1693_s8 = scalar_lea.vmem %s1083_s6, 32  ;;  %s1790_s15 = smov [#allocation9]  }
 0x157   : > { %v1022_v9 = vadd.f32 %v1021_v7, %v991_v4  ;;  %v954_v11 = vadd.f32 %v1967_v29, %v953_v6  ;;  %v996_v29 = vmul.f32 %v1987_v50, %v1987_v50  ;;  %p1694_p8 = scmp.ne.s32.totalorder %s1083_s6, %s1693_s8  ;;  %s1697_s18 = sshll.u32 %s1790_s15, 4  ;;  %s1698_s18 = int_to_ptr.vmem [resolvable:$false] %s1697_s18 }
 0x158   : > { %s1699_s4 = scalar_lea.vmem %s1698_s18, 64  ;;  %p1700_p0 = scmp.lt.s32.totalorder %s1083_s6, %s1698_s18 }
 0x159   : > { %v955_v27 = vadd.f32 %v954_v11, %v1985_v45  ;;  %v1023_v13 = vadd.f32 %v1022_v9, %v992_v8  ;;  %p1695_p12 = pnand %p1694_p8, %p2175_p4  ;;  %p1701_p2 = scmp.lt.s32.totalorder %s1699_s4, %s1693_s8 }
 0x15b   : > { %v1024_v34 = vadd.f32 %v1023_v13, %v993_v12  ;;  %v956_v14 = vadd.f32 %v955_v27, %v1991_v57  ;;  %p1696_p13 = pneg %p1695_p12  ;;  %p1702_p3 = por %p1701_p2, %p1700_p0 }
 0x15d   : > { %v957_v16 = vadd.f32 %v1981_v40, %v956_v14  ;;  %v1025_v18 = vadd.f32 %v1024_v34, %v994_v15  ;;  %v999_v40 = vmul.f32 %v1997_v0, %v1997_v0  ;;  %p1703_p5 = pnand %p1702_p3, %p1696_p13 }
 0x15f   : > { %v1026_v19 = vadd.f32 %v1025_v18, %v995_v25  ;;  %v958_v20 = vadd.f32 %v1987_v50, %v957_v16  ;;  %v1000_v50 = vmul.f32 %v2003_v10, %v2003_v10 }
 0x161   : > { %v959_v45 = vadd.f32 %v958_v20, %v2001_v5  ;;  %v1027_v22 = vadd.f32 %v1026_v19, %v996_v29 }
 0x163   : > { %v1028_v23 = vadd.f32 %v1027_v22, %v997_v21  ;;  %v960_v57 = vadd.f32 %v959_v45, %v2007_v17 }
 0x165   : > { %v961_v28 = vadd.f32 %v1997_v0, %v960_v57  ;;  %v1029_v30 = vadd.f32 %v1028_v23, %v998_v26  ;;  %v1002_v0 = vmul.f32 %v2025_v47, %v2025_v47 }
 0x167   : > { %v1030_v31 = vadd.f32 %v1029_v30, %v999_v40  ;;  %v962_v33 = vadd.f32 %v2003_v10, %v961_v28  ;;  %v1004_v10 = vmul.f32 %v2019_v38, %v2019_v38 }
 0x169   : > { %v963_v5 = vadd.f32 %v962_v33, %v2017_v32  ;;  %v1031_v36 = vadd.f32 %v1030_v31, %v1000_v50 }
 0x16b   : > { %v1032_v17 = vadd.f32 %v1031_v36, %v1001_v35  ;;  %v964_v37 = vadd.f32 %v963_v5, %v2025_v47 }
 0x16d   : > { %v965_v41 = vadd.f32 %v2013_v24, %v964_v37  ;;  %v1033_v42 = vadd.f32 %v1032_v17, %v1002_v0 }
 0x16f   : > { %v966_v32 = vadd.f32 %v2019_v38, %v965_v41  ;;  %v1034_v43 = vadd.f32 %v1033_v42, %v1003_v39 }
 0x171   : > { %v967_v44 = vrot.slane %v966_v32, 4  ;;  %v1035_v46 = vadd.f32 %v1034_v43, %v1004_v10 }
 0x173   : > { %v968_v48 = vadd.f32 %v967_v44, %v966_v32  ;;  %v1036_v49 = vrot.slane %v1035_v46, 4 }
 0x175   : > { %v969_v51 = vrot.slane %v968_v48, 2  ;;  %v1037_v52 = vadd.f32 %v1036_v49, %v1035_v46 }
 0x177   : > { %v970_v47 = vadd.f32 %v969_v51, %v968_v48  ;;  %v1038_v53 = vrot.slane %v1037_v52, 2 }
 0x179   : > { %v971_v54 = vrot.slane %v970_v47, 1  ;;  %v1039_v24 = vadd.f32 %v1038_v53, %v1037_v52 }
 0x17b   : > { %v1040_v55 = vrot.slane %v1039_v24, 1  ;;  %v972_v38 = vadd.f32 %v971_v54, %v970_v47 }
 0x17d   : > { %v1041_v56 = vadd.f32 %v1040_v55, %v1039_v24 }
 0x17f   : > { %v1043_v58 = vsel %vm1042_vm0, %v972_v38, %v1041_v56 }
 0x180   : > { %1044 = vst [vmem:[%s251_s5] sm:$0x3] %v1043_v58 }
 0x181   : > { %1706 = shalt.err (!%p1703_p5)
}
 0x182   : > { %s1707_s26 = scalar_lea.hbm %s2116_s7, 32  ;;  %s1711_s20 = scalar_lea.hbm %s2160_s3, 256 }
 0x183   : > { %p1708_p7 = scmp.ne.s32.totalorder %s2116_s7, %s1707_s26  ;;  %p1712_p11 = scmp.lt.s32.totalorder %s2116_s7, %s2160_s3 }
 0x184   : > { %p1713_p10 = scmp.lt.s32.totalorder %s1711_s20, %s1707_s26 }
 0x185   : > { %p1709_p6 = pnand %p1708_p7, %p2175_p4 }
 0x186   : > { %p1714_p1 = por %p1713_p10, %p1712_p11 }
 0x187   : > { %p1710_p9 = pneg %p1709_p6 }
 0x189   : > { %p1715_p8 = pnand %p1714_p1, %p1710_p9 }
 0x18b   : > { %1718 = shalt.err (!%p1715_p8)
}
 0x18c   : > { %1514 = dma.vmem_to_hbm [thread:$0]  (%p2175_p4), %s1083_s6, 32, %s2116_s7, %s1051_s25  }
 0x18d PF: > { %p1535_p12 = scmp.ge.s32.totalorder %s1781_s17, 2  ;;  %s1094_s24 = sand.u32 1, %s1761_s12  }
 0x18e   : > { %p2176_p13 = scmp.ne.s32.totalorder %s2167_s23, 0  ;;  %s1095_s29 = scalar_lea.sflag [#allocation5], %s1094_s24 }
 0x190   : > { %p1526_p0 = pnand %p1535_p12, %p2176_p13 }
 0x192   : > { %p1527_p2 = pneg %p1526_p0 }
 0x194   : > { %1752 = dma.done.wait (%p1527_p2), %s1095_s29, 2048  }
 0x195   : > { %1754 = vsyncadd (%p1527_p2), %s1095_s29, 4294965248  ;;  %s1104_s5 = scalar_lea.sflag [#allocation10], %s1094_s24 }
 0x196   : > { %1756 = dma.done.wait (%p1527_p2), %s1104_s5, 32  }
 0x197   : > { %1758 = vsyncadd (%p1527_p2), %s1104_s5, 4294967264  ;;  %s24_s17 = sadd.s32 1, %s1781_s17   ;;  %s2177_s12 = smov %s1765_s13 }
 0x198   : > { %p21_p3 = scmp.ge.s32.totalorder %s24_s17, 10   ;;  %s2178_s13 = smov %s1769_s14 }
 0x199   : > { %s2179_s14 = smov %s1909_s19  ;;  %s2180_s15 = smov %s1777_s16 }
 0x19a   : > { %s2181_s16 = smov %s2183_s28  ;;  %23 = sbr.rel (!%p21_p3) target bundleno = 9 (0x9), region = 103 }
 0x19f   :  { %1109 = vsyncpa [#allocation4], 1 }
 0x1a0   :  { %1111 = vsyncpa [#allocation4 + $0x1], 1 }
 0x1a1   :  { %1112 = vsyncpa [#allocation7], 1 }
 0x1a2   :  { %1113 = vsyncpa [#allocation5], 1 }
 0x1a3   :  { %1115 = vsyncpa [#allocation5 + $0x1], 1 }
 0x1a4   :  { %1116 = vsyncpa [#allocation10], 1 }
 0x1a5   :  { %1118 = vsyncpa [#allocation10 + $0x1], 1 }

</bundles_post_ra>
